<compile_context>
chip_gen: v5e
topology: v5e:2x2
jax: 0.10.0
libtpu: 0.0.40
codegen_flags: <defaults>
</compile_context>

<pallas_src>
import jax
import jax.numpy as jnp
import numpy as np
from jax.experimental import pallas as pl
from jax.experimental.pallas import tpu as pltpu


def adaln_zero_kernel(gamma_ref, x_ref, o_ref):
    """One grid step: out_tile = x_tile * gamma_tile (gamma broadcast over seq)."""
    # gamma_ref: (b_tile, 1, D), x_ref / o_ref: (b_tile, seq_tile, D)
    o_ref[...] = x_ref[...] * gamma_ref[...]


def _vmem_budget_bytes():
    """Generation-aware VMEM budget with headroom for compiler scratch."""
    try:
        cap = pltpu.get_tpu_info().vmem_capacity_bytes
    except Exception:
        cap = 128 * 1024 * 1024  # v5e/v6e default
    # ~25% headroom: 48 MiB on v7x (64 MiB VMEM), 96 MiB on v5e/v6e (128 MiB).
    return int(cap * 3 // 4)


def _choose_tiling(B, S, D, itemsize, vmem_budget):
    """Pick (b_tile, seq_tile) so each tile is a few MiB of lane-dense data."""
    # Total double-buffered in+out footprint target: ~24-32 MiB (capped by the
    # generation-aware budget), i.e. per-tile ~4-8 MiB.
    tile_footprint_budget = min(32 * 1024 * 1024, vmem_budget // 2)
    per_tile_target = max(2 * 1024 * 1024, tile_footprint_budget // 4)
    row_bytes = max(1, D * itemsize)
    rows = max(8, per_tile_target // row_bytes)

    if S <= rows:
        # Small S: fold batch into the block so per-step DMAs stay large.
        seq_tile = S
        b_tile = max(1, min(B, rows // max(S, 1)))
    else:
        # Large S: tile the sequence axis (multiple of 8 sublanes).
        seq_tile = max(8, (rows // 8) * 8)
        b_tile = 1
    return b_tile, seq_tile


def ada_ln_zero(x, cond, w, b):
    """AdaLNZero forward.

    x:    (B, S, D)  activations
    cond: (B, Dc)    conditioning
    w:    (Dc, D)    PRE-TRANSPOSED Linear weight (nn.Linear stores (D, Dc))
    b:    (D,)       Linear bias
    """
    B, S, D = x.shape
    Dc = cond.shape[-1]
    assert w.shape == (Dc, D), (
        f"w must be the pre-transposed Linear weight of shape (dim_cond, dim)="
        f"{(Dc, D)}, got {w.shape}")
    assert b.shape == (D,)
    assert cond.shape == (B, Dc)

    # gamma = sigmoid(cond @ W + b): O(B*D) work vs O(B*S*D) streamed bytes,
    # so it is effectively free as a plain XLA op.  Cast once to x.dtype so
    # the in-kernel gate multiply runs in the native (possibly bf16) dtype.
    gamma = jax.nn.sigmoid(
        jnp.dot(cond.astype(jnp.float32), w.astype(jnp.float32),
                preferred_element_type=jnp.float32)
        + b.astype(jnp.float32))
    gamma = gamma.astype(x.dtype).reshape(B, 1, D)

    itemsize = x.dtype.itemsize
    vmem_budget = _vmem_budget_bytes()
    b_tile, seq_tile = _choose_tiling(B, S, D, itemsize, vmem_budget)

    grid = (pl.cdiv(B, b_tile), pl.cdiv(S, seq_tile))

    # VMEM estimate: double-buffered x-in + out tiles, double-buffered gamma
    # tile (tiny), plus slack.
    est = (4 * b_tile * seq_tile * D * itemsize
           + 2 * b_tile * D * itemsize
           + (2 << 20))
    vmem_limit = int(min(max(2 * est, 16 * 1024 * 1024), vmem_budget))

    return pl.pallas_call(
        adaln_zero_kernel,
        out_shape=jax.ShapeDtypeStruct((B, S, D), x.dtype),
        grid=grid,
        in_specs=[
            pl.BlockSpec((b_tile, 1, D), lambda i, j: (i, 0, 0)),          # gamma
            pl.BlockSpec((b_tile, seq_tile, D), lambda i, j: (i, j, 0)),   # x tile
        ],
        out_specs=pl.BlockSpec((b_tile, seq_tile, D), lambda i, j: (i, j, 0)),
        compiler_params=pltpu.CompilerParams(
            dimension_semantics=("parallel", "parallel"),
            vmem_limit_bytes=vmem_limit,
        ),
    )(gamma, x)


def reference(x, cond, w, b):
    """Pure-JAX mirror of AdaLNZero.forward."""
    gamma = jax.nn.sigmoid(cond @ w + b)          # (B, D)
    return x * gamma[:, None, :]


if __name__ == "__main__":
    # Small but lane-dense shapes (D multiple of 128).
    B, S, D, Dc = 2, 128, 256, 256
    key = jax.random.PRNGKey(0)
    kx, kc, kw, kb = jax.random.split(key, 4)

    x = jax.random.normal(kx, (B, S, D), jnp.float32)
    cond = jax.random.normal(kc, (B, Dc), jnp.float32)

    # Small random weights so the gamma path is actually exercised
    # (forward-pass semantics identical to the module).
    w = 0.02 * jax.random.normal(kw, (Dc, D), jnp.float32)   # pre-transposed Linear weight
    b = -2.0 + 0.02 * jax.random.normal(kb, (D,), jnp.float32)

    out = jax.block_until_ready(ada_ln_zero(x, cond, w, b))
    ref = jax.block_until_ready(reference(x, cond, w, b))
    np.testing.assert_allclose(np.asarray(out), np.asarray(ref), rtol=2e-5, atol=2e-5)

    # Exact PyTorch init: zero weight, bias = -2.0 -> gamma == sigmoid(-2).
    w0 = jnp.zeros((Dc, D), jnp.float32)
    b0 = jnp.full((D,), -2.0, jnp.float32)
    out0 = jax.block_until_ready(ada_ln_zero(x, cond, w0, b0))
    ref0 = jax.block_until_ready(reference(x, cond, w0, b0))
    np.testing.assert_allclose(np.asarray(out0), np.asarray(ref0), rtol=2e-5, atol=2e-5)

    # bf16 activations exercise the native-dtype gate path (v6e/v7x bf16 VALU).
    xb = x.astype(jnp.bfloat16)
    outb = jax.block_until_ready(ada_ln_zero(xb, cond, w, b))
    refb = reference(xb.astype(jnp.float32), cond, w, b)
    np.testing.assert_allclose(np.asarray(outb, dtype=np.float32),
                               np.asarray(refb), rtol=2e-2, atol=2e-2)

    print("KERNEL_OK")
</pallas_src>

<mosaic_0001>
module attributes {stable_mosaic.version = 11 : i64} {
  func.func @adaln_zero_kernel(%arg0: i32, %arg1: i32, %arg2: memref<2x1x256xf32, #tpu.memory_space<vmem>>, %arg3: memref<2x128x256xf32, #tpu.memory_space<vmem>>, %arg4: memref<2x128x256xf32, #tpu.memory_space<vmem>>) attributes {dimension_semantics = [#tpu.dimension_semantics<parallel>, #tpu.dimension_semantics<parallel>], iteration_bounds = array<i64: 1, 1>, scalar_prefetch = 0 : i64, scratch_operands = 0 : i64, tpu.core_type = #tpu.core_type<tc>, window_params = [{transform_indices = @transform_0, window_bounds = array<i64: 2, 1, 256>}, {transform_indices = @transform_1, window_bounds = array<i64: 2, 128, 256>}, {transform_indices = @transform_2, window_bounds = array<i64: 2, 128, 256>}]} {
    %c0 = arith.constant 0 : index
    %c0_0 = arith.constant 0 : index
    %c0_1 = arith.constant 0 : index
    %0 = vector.load %arg3[%c0, %c0_0, %c0_1] : memref<2x128x256xf32, #tpu.memory_space<vmem>>, vector<2x128x256xf32>
    %c0_2 = arith.constant 0 : index
    %c0_3 = arith.constant 0 : index
    %c0_4 = arith.constant 0 : index
    %1 = vector.load %arg2[%c0_2, %c0_3, %c0_4] : memref<2x1x256xf32, #tpu.memory_space<vmem>>, vector<2x1x256xf32>
    %2 = vector.broadcast %1 : vector<2x1x256xf32> to vector<2x128x256xf32>
    %3 = arith.mulf %0, %2 : vector<2x128x256xf32>
    %c0_5 = arith.constant 0 : index
    %c0_6 = arith.constant 0 : index
    %c0_7 = arith.constant 0 : index
    %4 = vector.load %arg4[%c0_5, %c0_6, %c0_7] : memref<2x128x256xf32, #tpu.memory_space<vmem>>, vector<2x128x256xf32>
    tpu.vector_store %arg4[%c0_5, %c0_6, %c0_7], %3 {strides = array<i32>} : memref<2x128x256xf32, #tpu.memory_space<vmem>>, vector<2x128x256xf32>,
    return
  }
  func.func @transform_0(%arg0: i32, %arg1: i32) -> (i32, i32, i32) {
    %c0_i32 = arith.constant 0 : i32
    %c0_i32_0 = arith.constant 0 : i32
    %c0_i32_1 = arith.constant 0 : i32
    return %arg0, %c0_i32, %c0_i32_0 : i32, i32, i32
  }
  func.func @transform_1(%arg0: i32, %arg1: i32) -> (i32, i32, i32) {
    %c0_i32 = arith.constant 0 : i32
    %c0_i32_0 = arith.constant 0 : i32
    return %arg0, %arg1, %c0_i32 : i32, i32, i32
  }
  func.func @transform_2(%arg0: i32, %arg1: i32) -> (i32, i32, i32) {
    %c0_i32 = arith.constant 0 : i32
    %c0_i32_0 = arith.constant 0 : i32
    return %arg0, %arg1, %c0_i32 : i32, i32, i32
  }
}

</mosaic_0001>

<bundles_post_ra>
// kernel: tpu_custom_call.1
= control target key start
LH: loop header
LB: loop body
LE: loop exit
PB: predicated region body
PF: predicated region fallthrough
CT: control target
= control target key end

     0   :  { %7 = vsyncpa [#allocation3], 0  ;;  %s462_s0 = inlined_call_operand.hbm [shape: f32[2,1,256], index: 0, kind: input, shape index: {}]   ;;  %s463_s1 = inlined_call_operand.hbm [shape: f32[2,128,256], index: 1, kind: input, shape index: {}]   ;;  %s464_s2 = inlined_call_operand.hbm [shape: f32[2,128,256], index: 2, kind: output, shape index: {}]  }
   0x1   :  { %8 = vsyncpa [#allocation6], 0 }
   0x2   :  { %9 = vsyncpa [#allocation4], 0  ;;  %s14_s11 = sshll.u32 %s462_s0, 4  ;;  %s353_s12 = smov [#allocation2]   ;;  %s15_s11 = int_to_ptr.hbm [resolvable:$true] %s14_s11 }
   0x3   :  { %s16_s13 = sshll.u32 %s353_s12, 4  ;;  %s27_s16 = sshll.u32 %s463_s1, 4  ;;  %s17_s13 = int_to_ptr.vmem [resolvable:$true] %s16_s13  ;;  %s28_s16 = int_to_ptr.hbm [resolvable:$true] %s27_s16 }
   0x4   :  { %s354_s17 = smov 32   ;;  %s355_s18 = smov 2  }
   0x5   :  { %22 = dma.hbm_to_vmem [thread:$0]  %s15_s11, 64, %s17_s13, [#allocation3], %s354_s17, %s354_s17, %s355_s18  }
   0x6   :  { %s356_s19 = smov [#allocation5]   ;;  %s357_s21 = smov 256  }
   0x7   :  { %s29_s20 = sshll.u32 %s356_s19, 4  ;;  %s358_s22 = smov 16   ;;  %s30_s20 = int_to_ptr.vmem [resolvable:$true] %s29_s20 }
   0x8   :  { %35 = dma.hbm_to_vmem [thread:$0]  %s28_s16, 8192, %s30_s20, [#allocation6], %s357_s21, %s357_s21, %s358_s22  }
   0x9   :  { %347 = dma.done.wait [#allocation3], 64  }
   0xa   :  { %348 = vsyncadd [#allocation3], 4294967232 }
   0xb   :  { %349 = dma.done.wait [#allocation6], 8192  }
   0xc   :  { %350 = vsyncadd [#allocation6], 4294959104  ;;  %v44_v0 = vld [vmem:[#allocation5] sm:$0xff]  ;;  %v108_v1 = vld [vmem:[#allocation2] sm:$0x3]  ;;  %s359_s0 = smov [#allocation7]  }
   0xd   :  { %v45_v2 = vld [vmem:[#allocation5 + $0x8] sm:$0xff]  ;;  %v384_v3 = vperm.slane %v108_v1, 0  ;;  %v386_v4 = vperm.slane %v108_v1, 1  ;;  %v46_v5 = vld [vmem:[#allocation5 + $0x10] sm:$0xff]  ;;  %v47_v6 = vld [vmem:[#allocation5 + $0x18] sm:$0xff]  ;;  %s252_s1 = sshll.u32 %s359_s0, 4  ;;  %s253_s1 = int_to_ptr.vmem [resolvable:$true] %s252_s1 }
   0xe   :  { %v48_v7 = vld [vmem:[#allocation5 + $0x20] sm:$0xff]  ;;  %v49_v11 = vld [vmem:[#allocation5 + $0x28] sm:$0xff]  ;;  %v50_v13 = vld [vmem:[#allocation5 + $0x30] sm:$0xff]  ;;  %s254_s25 = sshll.u32 %s464_s2, 4  ;;  %s255_s25 = int_to_ptr.hbm [resolvable:$true] %s254_s25 }
   0xf   :  { %v120_v8 = vmul.f32 %v384_v3, %v44_v0  ;;  %v121_v9 = vmul.f32 %v386_v4, %v45_v2  ;;  %v122_v10 = vmul.f32 %v384_v3, %v46_v5  ;;  %v123_v12 = vmul.f32 %v386_v4, %v47_v6  ;;  %v51_v15 = vld [vmem:[#allocation5 + $0x38] sm:$0xff]  ;;  %v52_v17 = vld [vmem:[#allocation5 + $0x40] sm:$0xff]  ;;  %v53_v19 = vld [vmem:[#allocation5 + $0x48] sm:$0xff] }
  0x10   :  { %v124_v14 = vmul.f32 %v384_v3, %v48_v7  ;;  %v125_v16 = vmul.f32 %v386_v4, %v49_v11  ;;  %v126_v18 = vmul.f32 %v384_v3, %v50_v13  ;;  %v127_v20 = vmul.f32 %v386_v4, %v51_v15  ;;  %v54_v21 = vld [vmem:[#allocation5 + $0x50] sm:$0xff]  ;;  %v55_v23 = vld [vmem:[#allocation5 + $0x58] sm:$0xff]  ;;  %v56_v25 = vld [vmem:[#allocation5 + $0x60] sm:$0xff] }
  0x11   :  { %184 = vst [vmem:[#allocation7] sm:$0xff] %v120_v8  ;;  %v128_v22 = vmul.f32 %v384_v3, %v52_v17  ;;  %v129_v24 = vmul.f32 %v386_v4, %v53_v19  ;;  %v130_v26 = vmul.f32 %v384_v3, %v54_v21  ;;  %v57_v27 = vld [vmem:[#allocation5 + $0x68] sm:$0xff]  ;;  %v131_v28 = vmul.f32 %v386_v4, %v55_v23  ;;  %v58_v29 = vld [vmem:[#allocation5 + $0x70] sm:$0xff]  ;;  %v59_v31 = vld [vmem:[#allocation5 + $0x78] sm:$0xff] }
  0x12   :  { %185 = vst [vmem:[#allocation7 + $0x8] sm:$0xff] %v121_v9  ;;  %v132_v30 = vmul.f32 %v384_v3, %v56_v25  ;;  %v133_v32 = vmul.f32 %v386_v4, %v57_v27  ;;  %v60_v33 = vld [vmem:[#allocation5 + $0x80] sm:$0xff]  ;;  %v134_v34 = vmul.f32 %v384_v3, %v58_v29  ;;  %v61_v35 = vld [vmem:[#allocation5 + $0x88] sm:$0xff]  ;;  %v135_v36 = vmul.f32 %v386_v4, %v59_v31  ;;  %v62_v37 = vld [vmem:[#allocation5 + $0x90] sm:$0xff] }
  0x13   :  { %186 = vst [vmem:[#allocation7 + $0x10] sm:$0xff] %v122_v10  ;;  %v136_v38 = vmul.f32 %v384_v3, %v60_v33  ;;  %v63_v39 = vld [vmem:[#allocation5 + $0x98] sm:$0xff]  ;;  %v137_v40 = vmul.f32 %v386_v4, %v61_v35  ;;  %v64_v41 = vld [vmem:[#allocation5 + $0xa0] sm:$0xff]  ;;  %v138_v42 = vmul.f32 %v384_v3, %v62_v37  ;;  %v65_v43 = vld [vmem:[#allocation5 + $0xa8] sm:$0xff] }
  0x14   :  { %187 = vst [vmem:[#allocation7 + $0x18] sm:$0xff] %v123_v12  ;;  %v139_v44 = vmul.f32 %v386_v4, %v63_v39  ;;  %v66_v45 = vld [vmem:[#allocation5 + $0xb0] sm:$0xff]  ;;  %v140_v46 = vmul.f32 %v384_v3, %v64_v41  ;;  %v67_v47 = vld [vmem:[#allocation5 + $0xb8] sm:$0xff]  ;;  %v141_v48 = vmul.f32 %v386_v4, %v65_v43  ;;  %v68_v49 = vld [vmem:[#allocation5 + $0xc0] sm:$0xff] }
  0x15   :  { %188 = vst [vmem:[#allocation7 + $0x20] sm:$0xff] %v124_v14  ;;  %v142_v50 = vmul.f32 %v384_v3, %v66_v45  ;;  %v69_v51 = vld [vmem:[#allocation5 + $0xc8] sm:$0xff]  ;;  %v143_v52 = vmul.f32 %v386_v4, %v67_v47  ;;  %v70_v53 = vld [vmem:[#allocation5 + $0xd0] sm:$0xff]  ;;  %v144_v54 = vmul.f32 %v384_v3, %v68_v49  ;;  %v71_v55 = vld [vmem:[#allocation5 + $0xd8] sm:$0xff] }
  0x16   :  { %189 = vst [vmem:[#allocation7 + $0x28] sm:$0xff] %v125_v16  ;;  %v145_v56 = vmul.f32 %v386_v4, %v69_v51  ;;  %v72_v57 = vld [vmem:[#allocation5 + $0xe0] sm:$0xff]  ;;  %v109_v58 = vld [vmem:[#allocation2 + $0x2] sm:$0x3]  ;;  %v146_v59 = vmul.f32 %v384_v3, %v70_v53  ;;  %v73_v60 = vld [vmem:[#allocation5 + $0xe8] sm:$0xff]  ;;  %v147_v61 = vmul.f32 %v386_v4, %v71_v55 }
  0x17   :  { %190 = vst [vmem:[#allocation7 + $0x30] sm:$0xff] %v126_v18  ;;  %v74_v62 = vld [vmem:[#allocation5 + $0xf0] sm:$0xff]  ;;  %v148_v63 = vmul.f32 %v384_v3, %v72_v57  ;;  %v75_v0 = vld [vmem:[#allocation5 + $0xf8] sm:$0xff]  ;;  %v417_v1 = vperm.slane %v109_v58, 0  ;;  %v149_v2 = vmul.f32 %v386_v4, %v73_v60  ;;  %v76_v5 = vld [vmem:[#allocation5 + $0x100] sm:$0xff]  ;;  %v420_v6 = vperm.slane %v109_v58, 1 }
  0x18   :  { %191 = vst [vmem:[#allocation7 + $0x38] sm:$0xff] %v127_v20  ;;  %v150_v7 = vmul.f32 %v384_v3, %v74_v62  ;;  %v77_v8 = vld [vmem:[#allocation5 + $0x108] sm:$0xff]  ;;  %v151_v9 = vmul.f32 %v386_v4, %v75_v0  ;;  %v78_v10 = vld [vmem:[#allocation5 + $0x110] sm:$0xff]  ;;  %v79_v12 = vld [vmem:[#allocation5 + $0x118] sm:$0xff] }
  0x19   :  { %192 = vst [vmem:[#allocation7 + $0x40] sm:$0xff] %v128_v22  ;;  %v152_v11 = vmul.f32 %v417_v1, %v76_v5  ;;  %v153_v13 = vmul.f32 %v420_v6, %v77_v8  ;;  %v80_v14 = vld [vmem:[#allocation5 + $0x120] sm:$0xff]  ;;  %v154_v15 = vmul.f32 %v417_v1, %v78_v10  ;;  %v81_v16 = vld [vmem:[#allocation5 + $0x128] sm:$0xff]  ;;  %v155_v3 = vmul.f32 %v420_v6, %v79_v12  ;;  %v82_v17 = vld [vmem:[#allocation5 + $0x130] sm:$0xff] }
  0x1a   :  { %193 = vst [vmem:[#allocation7 + $0x48] sm:$0xff] %v129_v24  ;;  %v156_v4 = vmul.f32 %v417_v1, %v80_v14  ;;  %v83_v18 = vld [vmem:[#allocation5 + $0x138] sm:$0xff]  ;;  %v157_v19 = vmul.f32 %v420_v6, %v81_v16  ;;  %v84_v20 = vld [vmem:[#allocation5 + $0x140] sm:$0xff]  ;;  %v158_v21 = vmul.f32 %v417_v1, %v82_v17  ;;  %v85_v22 = vld [vmem:[#allocation5 + $0x148] sm:$0xff] }
  0x1b   :  { %194 = vst [vmem:[#allocation7 + $0x50] sm:$0xff] %v130_v26  ;;  %v159_v23 = vmul.f32 %v420_v6, %v83_v18  ;;  %v86_v24 = vld [vmem:[#allocation5 + $0x150] sm:$0xff]  ;;  %v160_v25 = vmul.f32 %v417_v1, %v84_v20  ;;  %v87_v26 = vld [vmem:[#allocation5 + $0x158] sm:$0xff]  ;;  %v161_v27 = vmul.f32 %v420_v6, %v85_v22  ;;  %v104_v60 = vld [vmem:[#allocation5 + $0x1e0] sm:$0xff] }
  0x1c   :  { %195 = vst [vmem:[#allocation7 + $0x58] sm:$0xff] %v131_v28  ;;  %v88_v28 = vld [vmem:[#allocation5 + $0x160] sm:$0xff]  ;;  %v162_v29 = vmul.f32 %v417_v1, %v86_v24  ;;  %v163_v31 = vmul.f32 %v420_v6, %v87_v26  ;;  %v103_v58 = vld [vmem:[#allocation5 + $0x1d8] sm:$0xff]  ;;  %v105_v62 = vld [vmem:[#allocation5 + $0x1e8] sm:$0xff] }
  0x1d   :  { %196 = vst [vmem:[#allocation7 + $0x60] sm:$0xff] %v132_v30  ;;  %v89_v30 = vld [vmem:[#allocation5 + $0x168] sm:$0xff]  ;;  %v164_v33 = vmul.f32 %v417_v1, %v88_v28  ;;  %v106_v0 = vld [vmem:[#allocation5 + $0x1f0] sm:$0xff]  ;;  %v107_v5 = vld [vmem:[#allocation5 + $0x1f8] sm:$0xff] }
  0x1e   :  { %197 = vst [vmem:[#allocation7 + $0x68] sm:$0xff] %v133_v32  ;;  %v90_v32 = vld [vmem:[#allocation5 + $0x170] sm:$0xff]  ;;  %v165_v35 = vmul.f32 %v420_v6, %v89_v30  ;;  %v182_v8 = vmul.f32 %v417_v1, %v106_v0 }
  0x1f   :  { %198 = vst [vmem:[#allocation7 + $0x70] sm:$0xff] %v134_v34  ;;  %v91_v34 = vld [vmem:[#allocation5 + $0x178] sm:$0xff]  ;;  %v166_v37 = vmul.f32 %v417_v1, %v90_v32 }
  0x20   :  { %199 = vst [vmem:[#allocation7 + $0x78] sm:$0xff] %v135_v36  ;;  %v92_v36 = vld [vmem:[#allocation5 + $0x180] sm:$0xff]  ;;  %v167_v39 = vmul.f32 %v420_v6, %v91_v34 }
  0x21   :  { %200 = vst [vmem:[#allocation7 + $0x80] sm:$0xff] %v136_v38  ;;  %v93_v38 = vld [vmem:[#allocation5 + $0x188] sm:$0xff]  ;;  %v168_v41 = vmul.f32 %v417_v1, %v92_v36 }
  0x22   :  { %201 = vst [vmem:[#allocation7 + $0x88] sm:$0xff] %v137_v40  ;;  %v94_v40 = vld [vmem:[#allocation5 + $0x190] sm:$0xff]  ;;  %v169_v43 = vmul.f32 %v420_v6, %v93_v38 }
  0x23   :  { %202 = vst [vmem:[#allocation7 + $0x90] sm:$0xff] %v138_v42  ;;  %v95_v42 = vld [vmem:[#allocation5 + $0x198] sm:$0xff]  ;;  %v170_v45 = vmul.f32 %v417_v1, %v94_v40 }
  0x24   :  { %203 = vst [vmem:[#allocation7 + $0x98] sm:$0xff] %v139_v44  ;;  %v96_v44 = vld [vmem:[#allocation5 + $0x1a0] sm:$0xff]  ;;  %v171_v47 = vmul.f32 %v420_v6, %v95_v42 }
  0x25   :  { %204 = vst [vmem:[#allocation7 + $0xa0] sm:$0xff] %v140_v46  ;;  %v97_v46 = vld [vmem:[#allocation5 + $0x1a8] sm:$0xff]  ;;  %v172_v49 = vmul.f32 %v417_v1, %v96_v44 }
  0x26   :  { %205 = vst [vmem:[#allocation7 + $0xa8] sm:$0xff] %v141_v48  ;;  %v98_v48 = vld [vmem:[#allocation5 + $0x1b0] sm:$0xff]  ;;  %v173_v51 = vmul.f32 %v420_v6, %v97_v46 }
  0x27   :  { %206 = vst [vmem:[#allocation7 + $0xb0] sm:$0xff] %v142_v50  ;;  %v99_v50 = vld [vmem:[#allocation5 + $0x1b8] sm:$0xff]  ;;  %v174_v53 = vmul.f32 %v417_v1, %v98_v48 }
  0x28   :  { %207 = vst [vmem:[#allocation7 + $0xb8] sm:$0xff] %v143_v52  ;;  %v100_v52 = vld [vmem:[#allocation5 + $0x1c0] sm:$0xff]  ;;  %v175_v55 = vmul.f32 %v420_v6, %v99_v50 }
  0x29   :  { %208 = vst [vmem:[#allocation7 + $0xc0] sm:$0xff] %v144_v54  ;;  %v101_v54 = vld [vmem:[#allocation5 + $0x1c8] sm:$0xff]  ;;  %v176_v57 = vmul.f32 %v417_v1, %v100_v52 }
  0x2a   :  { %209 = vst [vmem:[#allocation7 + $0xc8] sm:$0xff] %v145_v56  ;;  %v102_v56 = vld [vmem:[#allocation5 + $0x1d0] sm:$0xff] }
  0x2b   :  { %210 = vst [vmem:[#allocation7 + $0xd0] sm:$0xff] %v146_v59  ;;  %v177_v59 = vmul.f32 %v420_v6, %v101_v54 }
  0x2c   :  { %211 = vst [vmem:[#allocation7 + $0xd8] sm:$0xff] %v147_v61  ;;  %v178_v61 = vmul.f32 %v417_v1, %v102_v56 }
  0x2d   :  { %212 = vst [vmem:[#allocation7 + $0xe0] sm:$0xff] %v148_v63  ;;  %v179_v63 = vmul.f32 %v420_v6, %v103_v58 }
  0x2e   :  { %213 = vst [vmem:[#allocation7 + $0xe8] sm:$0xff] %v149_v2  ;;  %v180_v2 = vmul.f32 %v417_v1, %v104_v60 }
  0x2f   :  { %214 = vst [vmem:[#allocation7 + $0xf0] sm:$0xff] %v150_v7  ;;  %v181_v7 = vmul.f32 %v420_v6, %v105_v62 }
  0x30   :  { %215 = vst [vmem:[#allocation7 + $0xf8] sm:$0xff] %v151_v9  ;;  %v183_v9 = vmul.f32 %v420_v6, %v107_v5 }
  0x31   :  { %216 = vst [vmem:[#allocation7 + $0x100] sm:$0xff] %v152_v11 }
  0x32   :  { %217 = vst [vmem:[#allocation7 + $0x108] sm:$0xff] %v153_v13 }
  0x33   :  { %218 = vst [vmem:[#allocation7 + $0x110] sm:$0xff] %v154_v15 }
  0x34   :  { %219 = vst [vmem:[#allocation7 + $0x118] sm:$0xff] %v155_v3 }
  0x35   :  { %220 = vst [vmem:[#allocation7 + $0x120] sm:$0xff] %v156_v4 }
  0x36   :  { %221 = vst [vmem:[#allocation7 + $0x128] sm:$0xff] %v157_v19 }
  0x37   :  { %222 = vst [vmem:[#allocation7 + $0x130] sm:$0xff] %v158_v21 }
  0x38   :  { %223 = vst [vmem:[#allocation7 + $0x138] sm:$0xff] %v159_v23 }
  0x39   :  { %224 = vst [vmem:[#allocation7 + $0x140] sm:$0xff] %v160_v25 }
  0x3a   :  { %225 = vst [vmem:[#allocation7 + $0x148] sm:$0xff] %v161_v27 }
  0x3b   :  { %226 = vst [vmem:[#allocation7 + $0x150] sm:$0xff] %v162_v29 }
  0x3c   :  { %227 = vst [vmem:[#allocation7 + $0x158] sm:$0xff] %v163_v31 }
  0x3d   :  { %228 = vst [vmem:[#allocation7 + $0x160] sm:$0xff] %v164_v33 }
  0x3e   :  { %229 = vst [vmem:[#allocation7 + $0x168] sm:$0xff] %v165_v35 }
  0x3f   :  { %230 = vst [vmem:[#allocation7 + $0x170] sm:$0xff] %v166_v37 }
  0x40   :  { %231 = vst [vmem:[#allocation7 + $0x178] sm:$0xff] %v167_v39 }
  0x41   :  { %232 = vst [vmem:[#allocation7 + $0x180] sm:$0xff] %v168_v41 }
  0x42   :  { %233 = vst [vmem:[#allocation7 + $0x188] sm:$0xff] %v169_v43 }
  0x43   :  { %234 = vst [vmem:[#allocation7 + $0x190] sm:$0xff] %v170_v45 }
  0x44   :  { %235 = vst [vmem:[#allocation7 + $0x198] sm:$0xff] %v171_v47 }
  0x45   :  { %236 = vst [vmem:[#allocation7 + $0x1a0] sm:$0xff] %v172_v49 }
  0x46   :  { %237 = vst [vmem:[#allocation7 + $0x1a8] sm:$0xff] %v173_v51 }
  0x47   :  { %238 = vst [vmem:[#allocation7 + $0x1b0] sm:$0xff] %v174_v53 }
  0x48   :  { %239 = vst [vmem:[#allocation7 + $0x1b8] sm:$0xff] %v175_v55 }
  0x49   :  { %240 = vst [vmem:[#allocation7 + $0x1c0] sm:$0xff] %v176_v57 }
  0x4a   :  { %241 = vst [vmem:[#allocation7 + $0x1c8] sm:$0xff] %v177_v59 }
  0x4b   :  { %242 = vst [vmem:[#allocation7 + $0x1d0] sm:$0xff] %v178_v61 }
  0x4c   :  { %243 = vst [vmem:[#allocation7 + $0x1d8] sm:$0xff] %v179_v63 }
  0x4d   :  { %244 = vst [vmem:[#allocation7 + $0x1e0] sm:$0xff] %v180_v2 }
  0x4e   :  { %245 = vst [vmem:[#allocation7 + $0x1e8] sm:$0xff] %v181_v7 }
  0x4f   :  { %246 = vst [vmem:[#allocation7 + $0x1f0] sm:$0xff] %v182_v8 }
  0x50   :  { %247 = vst [vmem:[#allocation7 + $0x1f8] sm:$0xff] %v183_v9 }
  0x51   :  { %260 = dma.vmem_to_hbm [thread:$0]  %s253_s1, 8192, %s255_s25, [#allocation4], %s357_s21, %s357_s21, %s358_s22  }
  0x52   :  { %351 = dma.done.wait [#allocation4], 8192  }
  0x53   :  { %352 = vsyncadd [#allocation4], 4294959104 }
  0x54   :  { %265 = vsyncpa [#allocation3], 1 }
  0x55   :  { %266 = vsyncpa [#allocation6], 1 }
  0x56   :  { %267 = vsyncpa [#allocation4], 1 }

</bundles_post_ra>
